<compile_context>
chip_gen: v6e
topology: v6e:2x2x1
jax: 0.10.0
libtpu: 0.0.40
codegen_flags: <defaults>
</compile_context>

<pallas_src>
import jax
import jax.numpy as jnp
from jax import lax
from jax.experimental import pallas as pl
from jax.experimental.pallas import tpu as pltpu


def _self_attn_kernel(x_ref, w1_ref, b1_ref, w2_ref, o_ref):
    # x_ref:  (Bb, T, 2H)   block of batch elements (batch-major, full T)
    # w1_ref: (d_a, 2H)     linear1 weight (untransposed, torch layout)
    # b1_ref: (1, d_a)      linear1 bias
    # w2_ref: (r, d_a)      linear2 weight (untransposed, no bias)
    # o_ref:  (Bb, r*2H)    lane-dense output rows
    x3 = x_ref[...].astype(jnp.float32)            # [Bb, T, 2H]
    bb, t, h2 = x3.shape
    d_a = w1_ref.shape[0]
    r = w2_ref.shape[0]

    # Fused rows for the two linears: (Bb*T, 2H).  T is a multiple of 8, so
    # this collapse is a sublane-aligned retile (no data movement).
    x2 = x3.reshape(bb * t, h2)

    # Linear1 (+bias) + tanh, contracting 2H against w1's last dim (trans_b).
    h = jnp.tanh(
        lax.dot_general(
            x2, w1_ref[...],
            dimension_numbers=(((1,), (1,)), ((), ())),
            preferred_element_type=jnp.float32,
        )
        + b1_ref[...]
    )                                              # [Bb*T, d_a]

    # Linear2 (no bias).
    s = lax.dot_general(
        h, w2_ref[...],
        dimension_numbers=(((1,), (1,)), ((), ())),
        preferred_element_type=jnp.float32,
    )                                              # [Bb*T, r]

    # Softmax over the r axis (dim=2 of [B, T, r] in the torch code).
    s = s - jnp.max(s, axis=-1, keepdims=True)
    e = jnp.exp(s)
    a = e / jnp.sum(e, axis=-1, keepdims=True)     # [Bb*T, r]
    a3 = a.reshape(bb, t, r)                       # [Bb, T, r]

    # M[b, j, :] = sum_t a3[b, t, j] * x3[b, t, :]
    # r is tiny (4): do r lane-broadcast multiplies + sublane reductions over T
    # and assemble the lane-dense (Bb, r*2H) row directly (no a.T transpose,
    # no batched/transposed MXU dot needed).
    parts = []
    for j in range(r):
        wj = a3[:, :, j:j + 1]                     # [Bb, T, 1]
        parts.append(jnp.sum(wj * x3, axis=1))     # [Bb, 2H]
    m = jnp.concatenate(parts, axis=-1)            # [Bb, r*2H]
    o_ref[...] = m.astype(o_ref.dtype)


def _choose_block_b(B, T_pad, H2, budget_bytes=8 << 20):
    """Pick batch elements per grid step: big enough to amortize per-step
    overhead, small enough to fit comfortably in the default scoped VMEM on
    every generation (sized against v7x's 64 MiB physical / 32 MiB scoped)."""
    per_b = 2 * T_pad * H2 * 4                     # double-buffered f32 x rows
    max_bb = max(1, budget_bytes // per_b)
    bb = min(B, 64, max_bb)
    if bb >= B:
        return B                                   # full batch per step
    return max(8, (bb // 8) * 8)                   # keep (8,128) block rule


def self_attn_forward(x_tbh, w1, b1, w2):
    """x_tbh: [T, B, 2H] (torch convention). Returns M: [B, r, 2H]."""
    T, B, H2 = x_tbh.shape
    d_a = w1.shape[0]
    r = w2.shape[0]

    # Batch-major layout for the kernel (single fused XLA transpose).
    x_bth = jnp.transpose(x_tbh, (1, 0, 2))        # [B, T, 2H]

    # Zero-pad T to a multiple of 8: zero rows contribute 0 to M, and it makes
    # the in-kernel row-fusing reshape sublane-aligned.
    T_pad = ((T + 7) // 8) * 8
    if T_pad != T:
        x_bth = jnp.pad(x_bth, ((0, 0), (0, T_pad - T), (0, 0)))

    b1_2d = b1.reshape(1, d_a)

    Bb = _choose_block_b(B, T_pad, H2)
    grid = (pl.cdiv(B, Bb),)

    grid_spec = pltpu.PrefetchScalarGridSpec(
        num_scalar_prefetch=0,
        grid=grid,
        in_specs=[
            pl.BlockSpec((Bb, T_pad, H2), lambda i: (i, 0, 0)),
            pl.BlockSpec((d_a, H2), lambda i: (0, 0)),   # VMEM-resident weights
            pl.BlockSpec((1, d_a), lambda i: (0, 0)),
            pl.BlockSpec((r, d_a), lambda i: (0, 0)),
        ],
        # Lane-dense output: (B, r*2H) rows, reshaped to (B, r, 2H) below.
        out_specs=pl.BlockSpec((Bb, r * H2), lambda i: (i, 0)),
    )

    out_flat = pl.pallas_call(
        _self_attn_kernel,
        out_shape=jax.ShapeDtypeStruct((B, r * H2), x_tbh.dtype),
        grid_spec=grid_spec,
        compiler_params=pltpu.CompilerParams(
            dimension_semantics=("parallel",)
        ),
    )(x_bth, w1, b1_2d, w2)

    return out_flat.reshape(B, r, H2)


def self_attn_reference(x_tbh, w1, b1, w2):
    """Pure-JAX reference mirroring the PyTorch forward exactly."""
    h = jnp.tanh(jnp.einsum("tbh,dh->tbd", x_tbh, w1) + b1)   # [T,B,d_a]
    s = jnp.einsum("tbd,rd->tbr", h, w2)                      # [T,B,r]
    s_bt = jnp.transpose(s, (1, 0, 2))                        # [B,T,r]
    a = jax.nn.softmax(s_bt, axis=2)                          # softmax over r
    a = jnp.transpose(a, (0, 2, 1))                           # [B,r,T]
    x_bt = jnp.transpose(x_tbh, (1, 0, 2))                    # [B,T,2H]
    return jnp.einsum("brt,bth->brh", a, x_bt)                # [B,r,2H]


if __name__ == "__main__":
    # Small shapes consistent with the module: hidden_size=16 -> 2H=32
    hidden_size, d_a, r = 16, 16, 4
    T, B = 8, 2
    H2 = 2 * hidden_size

    key = jax.random.PRNGKey(0)
    k_x, k_w1, k_b1, k_w2 = jax.random.split(key, 4)

    x = jax.random.normal(k_x, (T, B, H2), dtype=jnp.float32)
    # Deterministic parameter init (uniform, PyTorch-Linear-style bound)
    bound1 = 1.0 / (H2 ** 0.5)
    w1 = jax.random.uniform(k_w1, (d_a, H2), jnp.float32, -bound1, bound1)
    b1 = jax.random.uniform(k_b1, (d_a,), jnp.float32, -bound1, bound1)
    bound2 = 1.0 / (d_a ** 0.5)
    w2 = jax.random.uniform(k_w2, (r, d_a), jnp.float32, -bound2, bound2)

    out = self_attn_forward(x, w1, b1, w2)
    out = jax.block_until_ready(out)

    ref = self_attn_reference(x, w1, b1, w2)
    assert out.shape == (B, r, H2)
    assert jnp.allclose(out, ref, atol=1e-5, rtol=1e-5)

    print("KERNEL_OK")
</pallas_src>

<mosaic_0001>
module attributes {stable_mosaic.version = 11 : i64} {
  func.func @_self_attn_kernel(%arg0: i32, %arg1: memref<2x8x32xf32, #tpu.memory_space<vmem>>, %arg2: memref<16x32xf32, #tpu.memory_space<vmem>>, %arg3: memref<1x16xf32, #tpu.memory_space<vmem>>, %arg4: memref<4x16xf32, #tpu.memory_space<vmem>>, %arg5: memref<2x128xf32, #tpu.memory_space<vmem>>) attributes {dimension_semantics = [#tpu.dimension_semantics<parallel>], iteration_bounds = array<i64: 1>, scalar_prefetch = 0 : i64, scratch_operands = 0 : i64, tpu.core_type = #tpu.core_type<tc>, window_params = [{transform_indices = @transform_0, window_bounds = array<i64: 2, 8, 32>}, {pipeline_mode = #tpu.pipeline_mode<synchronous>, transform_indices = @transform_1, window_bounds = array<i64: 16, 32>}, {pipeline_mode = #tpu.pipeline_mode<synchronous>, transform_indices = @transform_2, window_bounds = array<i64: 1, 16>}, {pipeline_mode = #tpu.pipeline_mode<synchronous>, transform_indices = @transform_3, window_bounds = array<i64: 4, 16>}, {transform_indices = @transform_4, window_bounds = array<i64: 2, 128>}]} {
    %c0 = arith.constant 0 : index
    %c0_0 = arith.constant 0 : index
    %c0_1 = arith.constant 0 : index
    %0 = vector.load %arg1[%c0, %c0_0, %c0_1] : memref<2x8x32xf32, #tpu.memory_space<vmem>>, vector<2x8x32xf32>
    %1 = vector.shape_cast %0 : vector<2x8x32xf32> to vector<16x32xf32>
    %c0_2 = arith.constant 0 : index
    %c0_3 = arith.constant 0 : index
    %2 = vector.load %arg2[%c0_2, %c0_3] : memref<16x32xf32, #tpu.memory_space<vmem>>, vector<16x32xf32>
    %cst = arith.constant dense<0.000000e+00> : vector<16x16xf32>
    %3 = tpu.matmul %1, %2, %cst {dimension_numbers = #tpu.dot_dimension_numbers<[1], [1], [0], [0], [0, 0, 1, 0], [], []>} : vector<16x32xf32>, vector<16x32xf32>, vector<16x16xf32> -> vector<16x16xf32>
    %c0_4 = arith.constant 0 : index
    %c0_5 = arith.constant 0 : index
    %4 = vector.load %arg3[%c0_4, %c0_5] : memref<1x16xf32, #tpu.memory_space<vmem>>, vector<1x16xf32>
    %5 = vector.broadcast %4 : vector<1x16xf32> to vector<16x16xf32>
    %6 = arith.addf %3, %5 : vector<16x16xf32>
    %7 = math.tanh %6 : vector<16x16xf32>
    %c0_6 = arith.constant 0 : index
    %c0_7 = arith.constant 0 : index
    %8 = vector.load %arg4[%c0_6, %c0_7] : memref<4x16xf32, #tpu.memory_space<vmem>>, vector<4x16xf32>
    %cst_8 = arith.constant dense<0.000000e+00> : vector<16x4xf32>
    %9 = tpu.matmul %7, %8, %cst_8 {dimension_numbers = #tpu.dot_dimension_numbers<[1], [1], [0], [0], [0, 0, 1, 0], [], []>} : vector<16x16xf32>, vector<4x16xf32>, vector<16x4xf32> -> vector<16x4xf32>
    %cst_9 = arith.constant dense<0xFF800000> : vector<16xf32>
    %10 = vector.multi_reduction <maximumf>, %9, %cst_9 [1] : vector<16x4xf32> to vector<16xf32>
    %11 = vector.shape_cast %10 : vector<16xf32> to vector<16x1xf32>
    %12 = vector.broadcast %11 : vector<16x1xf32> to vector<16x4xf32>
    %13 = arith.subf %9, %12 : vector<16x4xf32>
    %14 = math.exp %13 : vector<16x4xf32>
    %cst_10 = arith.constant dense<0.000000e+00> : vector<16xf32>
    %15 = vector.multi_reduction <add>, %14, %cst_10 [1] : vector<16x4xf32> to vector<16xf32>
    %16 = vector.shape_cast %15 : vector<16xf32> to vector<16x1xf32>
    %17 = vector.broadcast %16 : vector<16x1xf32> to vector<16x4xf32>
    %18 = arith.divf %14, %17 : vector<16x4xf32>
    %19 = vector.shape_cast %18 : vector<16x4xf32> to vector<2x8x4xf32>
    %20 = vector.extract_strided_slice %19 {offsets = [0, 0, 0], sizes = [2, 8, 1], strides = [1, 1, 1]} : vector<2x8x4xf32> to vector<2x8x1xf32>
    %21 = vector.broadcast %20 : vector<2x8x1xf32> to vector<2x8x32xf32>
    %22 = arith.mulf %21, %0 : vector<2x8x32xf32>
    %cst_11 = arith.constant dense<0.000000e+00> : vector<2x32xf32>
    %23 = vector.multi_reduction <add>, %22, %cst_11 [1] : vector<2x8x32xf32> to vector<2x32xf32>
    %24 = vector.extract_strided_slice %19 {offsets = [0, 0, 1], sizes = [2, 8, 1], strides = [1, 1, 1]} : vector<2x8x4xf32> to vector<2x8x1xf32>
    %25 = vector.broadcast %24 : vector<2x8x1xf32> to vector<2x8x32xf32>
    %26 = arith.mulf %25, %0 : vector<2x8x32xf32>
    %cst_12 = arith.constant dense<0.000000e+00> : vector<2x32xf32>
    %27 = vector.multi_reduction <add>, %26, %cst_12 [1] : vector<2x8x32xf32> to vector<2x32xf32>
    %28 = vector.extract_strided_slice %19 {offsets = [0, 0, 2], sizes = [2, 8, 1], strides = [1, 1, 1]} : vector<2x8x4xf32> to vector<2x8x1xf32>
    %29 = vector.broadcast %28 : vector<2x8x1xf32> to vector<2x8x32xf32>
    %30 = arith.mulf %29, %0 : vector<2x8x32xf32>
    %cst_13 = arith.constant dense<0.000000e+00> : vector<2x32xf32>
    %31 = vector.multi_reduction <add>, %30, %cst_13 [1] : vector<2x8x32xf32> to vector<2x32xf32>
    %32 = vector.extract_strided_slice %19 {offsets = [0, 0, 3], sizes = [2, 8, 1], strides = [1, 1, 1]} : vector<2x8x4xf32> to vector<2x8x1xf32>
    %33 = vector.broadcast %32 : vector<2x8x1xf32> to vector<2x8x32xf32>
    %34 = arith.mulf %33, %0 : vector<2x8x32xf32>
    %cst_14 = arith.constant dense<0.000000e+00> : vector<2x32xf32>
    %35 = vector.multi_reduction <add>, %34, %cst_14 [1] : vector<2x8x32xf32> to vector<2x32xf32>
    %36 = tpu.concatenate %23, %27, %31, %35 in 1 : vector<2x32xf32>, vector<2x32xf32>, vector<2x32xf32>, vector<2x32xf32> -> vector<2x128xf32>
    %c0_15 = arith.constant 0 : index
    %c0_16 = arith.constant 0 : index
    %37 = vector.load %arg5[%c0_15, %c0_16] : memref<2x128xf32, #tpu.memory_space<vmem>>, vector<2x128xf32>
    tpu.vector_store %arg5[%c0_15, %c0_16], %36 {strides = array<i32>} : memref<2x128xf32, #tpu.memory_space<vmem>>, vector<2x128xf32>,
    return
  }
  func.func @transform_0(%arg0: i32) -> (i32, i32, i32) {
    %c0_i32 = arith.constant 0 : i32
    %c0_i32_0 = arith.constant 0 : i32
    %c0_i32_1 = arith.constant 0 : i32
    return %arg0, %c0_i32, %c0_i32_0 : i32, i32, i32
  }
  func.func @transform_1(%arg0: i32) -> (i32, i32) {
    %c0_i32 = arith.constant 0 : i32
    %c0_i32_0 = arith.constant 0 : i32
    %c0_i32_1 = arith.constant 0 : i32
    return %c0_i32, %c0_i32_0 : i32, i32
  }
  func.func @transform_2(%arg0: i32) -> (i32, i32) {
    %c0_i32 = arith.constant 0 : i32
    %c0_i32_0 = arith.constant 0 : i32
    %c0_i32_1 = arith.constant 0 : i32
    return %c0_i32, %c0_i32_0 : i32, i32
  }
  func.func @transform_3(%arg0: i32) -> (i32, i32) {
    %c0_i32 = arith.constant 0 : i32
    %c0_i32_0 = arith.constant 0 : i32
    %c0_i32_1 = arith.constant 0 : i32
    return %c0_i32, %c0_i32_0 : i32, i32
  }
  func.func @transform_4(%arg0: i32) -> (i32, i32) {
    %c0_i32 = arith.constant 0 : i32
    %c0_i32_0 = arith.constant 0 : i32
    return %arg0, %c0_i32 : i32, i32
  }
}

</mosaic_0001>

<bundles_post_ra>
// kernel: tpu_custom_call.1
= control target key start
LH: loop header
LB: loop body
LE: loop exit
PB: predicated region body
PF: predicated region fallthrough
CT: control target
= control target key end

     0   :  { %9 = vsyncpa [#allocation3], 0  ;;  %s611_s0 = inlined_call_operand.hbm [shape: f32[2,8,32], index: 0, kind: input, shape index: {}]   ;;  %s612_s1 = inlined_call_operand.hbm [shape: f32[16,32], index: 1, kind: input, shape index: {}]   ;;  %s613_s2 = inlined_call_operand.vmem [shape: f32[1,16], index: 2, kind: input, shape index: {}]   ;;  %s614_s3 = inlined_call_operand.vmem [shape: f32[4,16], index: 3, kind: input, shape index: {}]   ;;  %s615_s4 = inlined_call_operand.hbm [shape: f32[2,128], index: 4, kind: output, shape index: {}]  }
   0x1   :  { %10 = vsyncpa [#allocation6], 0 }
   0x2   :  { %11 = vsyncpa [#allocation4], 0  ;;  %s522_s15 = smov [#allocation2]  }
   0x3   :  { %s17_s16 = sshll.u32 %s522_s15, 4  ;;  %s18_s16 = int_to_ptr.vmem [resolvable:$true] %s17_s16 }
   0x4   :  { %s464_s17 = scalar_lea.vmem %s18_s16, 256  ;;  %p469_p1 = scmp.lt.s32.totalorder %s18_s16, %s18_s16 }
   0x5   :  { %p465_p0 = scmp.ne.s32.totalorder %s18_s16, %s464_s17  ;;  %p470_p2 = scmp.lt.s32.totalorder %s464_s17, %s464_s17 }
   0x7   :  { %p471_p3 = por %p470_p2, %p469_p1 }
   0x9   :  { %p472_p4 = pnand %p471_p3, %p465_p0 }
   0xb   :  { %475 = shalt.err (!%p472_p4)
}
   0xc   :  { %s523_s18 = smov 128   ;;  %s524_s19 = smov 8  }
   0xd   :  { %23 = dma.hbm_to_vmem [thread:$0]  %s611_s0, 256, %s18_s16, [#allocation3], %s523_s18, %s523_s18, %s524_s19  }
   0xe   :  { %s525_s22 = smov [#allocation5]  }
   0xf   :  { %s29_s23 = sshll.u32 %s525_s22, 4  ;;  %s30_s23 = int_to_ptr.vmem [resolvable:$true] %s29_s23 }
  0x10   :  { %s484_s24 = scalar_lea.vmem %s30_s23, 256  ;;  %p489_p6 = scmp.lt.s32.totalorder %s30_s23, %s30_s23 }
  0x11   :  { %p485_p5 = scmp.ne.s32.totalorder %s30_s23, %s484_s24  ;;  %p490_p7 = scmp.lt.s32.totalorder %s484_s24, %s484_s24 }
  0x13   :  { %p491_p8 = por %p490_p7, %p489_p6 }
  0x15   :  { %p492_p9 = pnand %p491_p8, %p485_p5 }
  0x17   :  { %495 = shalt.err (!%p492_p9)
}
  0x18   :  { %35 = dma.hbm_to_vmem [thread:$0]  %s612_s1, 256, %s30_s23, [#allocation6], %s523_s18, %s523_s18, %s524_s19  }
  0x19   :  { %516 = dma.done.wait [#allocation3], 256  }
  0x1a   :  { %517 = vsyncadd [#allocation3], 4294967040 }
  0x1b   :  { %518 = dma.done.wait [#allocation6], 256  }
  0x1c   :  { %519 = vsyncadd [#allocation6], 4294967040  ;;  %vm57_vm0 = vcmask 261120   ;;  %v49_v0 = vld [vmem:[#allocation5 + $0x8] sm:$0xff]  ;;  %v48_v1 = vld [vmem:[#allocation5] sm:$0xff]  ;;  %vm148_vm1 = vcmask 130048  }
  0x1d   :  { %v565_v2 = vld [vmem:[#allocation2] sm:$0xff]  ;;  %414 = vmatprep.subr.msk.mxu0 %vm57_vm0, %v49_v0  ;;  %v573_v3 = vld [vmem:[#allocation2 + $0x8] sm:$0xff]  ;;  %vm233_vm2 = vcmask 31744   ;;  %v526_v26 = vmov 1   ;;  %v527_v33 = vmov 3   ;;  %v528_v34 = vmov 2  }
  0x1e   :  { %418 = vmatprep.mubr.msk.f32.mxu0 %vm57_vm0, %v565_v2  ;;  %415 = vmatpush3.xpose.msk.msra.mxu0 %vm57_vm0, %v49_v0  ;;  %v147_v4 = vld [vmem:[%s614_s3] sm:$0xf]  ;;  %v529_v35 = vmov 0   ;;  %vm356_vm3 = vcmask 1041409   ;;  %s531_s3 = smov 64   ;;  %s532_s29 = smov 96  }
  0x1f   :  { %416 = vmatprep.subr.msk.mxu0 %vm57_vm0, %v48_v1  ;;  %421 = vmatprep.subr.msk.mxu1 %vm148_vm1, %v147_v4  ;;  %v399_v5 = vld [vmem:[%s613_s2] ss:$0 sm:$0xff]  ;;  %s530_s2 = smov 32   ;;  %vm378_vm4 = vcmask 523264   ;;  %s533_s30 = smov [#allocation7]   ;;  %vm380_vm5 = vcmask 785408  }
  0x20   :  { %422 = vmatpush3.xpose.msk.msra.mxu1 %vm148_vm1, %v147_v4  ;;  %438 = vset.pattern.permute.xlu0 %v526_v26  ;;  %s389_s5 = sshll.u32 %s533_s30, 4  ;;  %s390_s5 = int_to_ptr.vmem [resolvable:$true] %s389_s5 }
  0x21   :  { %439 = vset.pattern.permute.xlu1 %v526_v26  ;;  %s496_s6 = scalar_lea.vmem %s390_s5, 32  ;;  %p501_p11 = scmp.lt.s32.totalorder %s390_s5, %s390_s5 }
  0x22   :  { %417 = vmatpush3.xpose.msk.msra.mxu0 %vm57_vm0, %v48_v1  ;;  %p497_p10 = scmp.ne.s32.totalorder %s390_s5, %s496_s6  ;;  %p502_p12 = scmp.lt.s32.totalorder %s496_s6, %s496_s6 }
  0x24   :  { %p503_p13 = por %p502_p12, %p501_p11 }
  0x25   :  { %419 = vmatmul.mubr.msk.f32.vlgmr.msra.gmra.mxu0 %vm57_vm0, %v573_v3 }
  0x26   :  { %p504_p0 = pnand %p503_p13, %p497_p10 }
  0xe5   :  { %v420_v6 = vpop.f32.mrf.mxu0 }
  0xe6   :  { %v142_v7 = vadd.f32 %v420_v6, %v399_v5 }
  0xe7   :  { %v136_v8 = vpop.f32.mrf.mxu0 }
  0xe8   :  { %v137_v9 = vadd.f32 %v399_v5, %v136_v8 }
  0xea   :  { %444 = vtanh.f32 %v137_v9 }
  0xeb   :  { %446 = vtanh.f32 %v142_v7 }
  0xf7   :  { %v445_v10 = vpop.eup %444 }
  0xf8   :  { %v447_v11 = vpop.eup %446  ;;  %423 = vmatprep.mubr.msk.f32.mxu1 %vm148_vm1, %v445_v10 }
  0xf9   :  { %424 = vmatmul.mubr.msk.f32.vlgmr.msra.gmra.mxu1 %vm148_vm1, %v447_v11 }
 0x1b9   :  { %v425_v12 = vpop.f32.mrf.mxu1 }
 0x1ba   :  { %v237_v15 = vsel %vm233_vm2, %v425_v12, -inf }
 0x1bb   :  { %v224_v13 = vpop.f32.mrf.mxu1 }
 0x1bc   :  { %v234_v14 = vsel %vm233_vm2, %v224_v13, -inf }
 0x1bd   :  { %235 = vmax.xlane.f32.xlu0 %v234_v14 }
 0x1c1   :  { %238 = vmax.xlane.f32.xlu0 %v237_v15 }
 0x246   :  { %v236_v16 = vpop.xlane.xlu0 %235 }
 0x247   :  { %v240_v17 = vsub.f32 %v224_v13, %v236_v16 }
 0x249   :  { %v242_v18 = vmul.f32 1.442695, %v240_v17 }
 0x24a   :  { %v239_v19 = vpop.xlane.xlu0 %238 }
 0x24b   :  { %448 = vpow2.f32 %v242_v18  ;;  %v241_v20 = vsub.f32 %v425_v12, %v239_v19 }
 0x24d   :  { %v244_v21 = vmul.f32 1.442695, %v241_v20 }
 0x24f   :  { %450 = vpow2.f32 %v244_v21 }
 0x258   :  { %v449_v22 = vpop.eup %448 }
 0x259   :  { %v246_v23 = vsel %vm233_vm2, %v449_v22, 0.0 }
 0x25a   :  { %247 = vadd.xlane.f32.xlu1 %v246_v23 }
 0x25c   :  { %v451_v24 = vpop.eup %450 }
 0x25d   :  { %v249_v25 = vsel %vm233_vm2, %v451_v24, 0.0 }
 0x25e   :  { %250 = vadd.xlane.f32.xlu1 %v249_v25 }
 0x2e3   :  { %v248_v27 = vpop.xlane.xlu1 %247 }
 0x2e4   :  { %452 = vrcp.f32 %v248_v27 }
 0x2e7   :  { %v251_v28 = vpop.xlane.xlu1 %250 }
 0x2e8   :  { %454 = vrcp.f32 %v251_v28 }
 0x2f1   :  { %v453_v29 = vpop.eup %452 }
 0x2f2   :  { %v253_v30 = vmul.f32 %v453_v29, %v449_v22 }
 0x2f4   :  { %283 = vperm.xlu0 %438, %v253_v30  }
 0x2f5   :  { %v455_v31 = vpop.eup %454 }
 0x2f6   :  { %v255_v32 = vmul.f32 %v455_v31, %v451_v24 }
 0x2f8   :  { %287 = vperm.xlu1 %439, %v255_v32   ;;  %443 = vset.pattern.permute.xlu0 %v527_v33 }
 0x2fc   :  { %440 = vset.pattern.permute.xlu1 %v528_v34 }
 0x2fd   :  { %311 = vperm.xlu1 %440, %v255_v32  }
 0x301   :  { %307 = vperm.xlu1 %440, %v253_v30  }
 0x305   :  { %441 = vset.pattern.permute.xlu1 %v527_v33 }
 0x306   :  { %331 = vperm.xlu1 %441, %v253_v30  }
 0x30a   :  { %335 = vperm.xlu1 %441, %v255_v32  }
 0x30e   :  { %442 = vset.pattern.permute.xlu1 %v529_v35 }
 0x30f   :  { %258 = vperm.xlu1 %442, %v253_v30  }
 0x313   :  { %263 = vperm.xlu1 %442, %v255_v32  }
 0x36f   :  { %v284_v36 = vpop.permute.xlu0 %283 }
 0x370   :  { %v290_v37 = vmul.f32 %v284_v36, %v565_v2 }
 0x372   :  { %v292_v38 = vsel %vm57_vm0, %v290_v37, 0.0 }
 0x373   :  { %v293_v39 = vrot.slane %v292_v38, 4  ;;  %v288_v40 = vpop.permute.xlu1 %287 }
 0x374   :  { %v291_v41 = vmul.f32 %v288_v40, %v573_v3 }
 0x375   :  { %v294_v42 = vadd.f32 %v293_v39, %v292_v38 }
 0x376   :  { %v299_v43 = vsel %vm57_vm0, %v291_v41, 0.0 }
 0x377   :  { %v295_v44 = vrot.slane %v294_v42, 2  ;;  %v300_v45 = vrot.slane %v299_v43, 4 }
 0x378   :  { %v312_v46 = vpop.permute.xlu1 %311 }
 0x379   :  { %v296_v47 = vadd.f32 %v295_v44, %v294_v42  ;;  %v301_v48 = vadd.f32 %v300_v45, %v299_v43  ;;  %v315_v49 = vmul.f32 %v312_v46, %v573_v3 }
 0x37b   :  { %v302_v50 = vrot.slane %v301_v48, 2  ;;  %v323_v51 = vsel %vm57_vm0, %v315_v49, 0.0  ;;  %v297_v54 = vrot.slane %v296_v47, 1 }
 0x37c   :  { %v324_v52 = vrot.slane %v323_v51, 4  ;;  %v308_v53 = vpop.permute.xlu1 %307 }
 0x37d   :  { %v303_v55 = vadd.f32 %v302_v50, %v301_v48  ;;  %v314_v56 = vmul.f32 %v308_v53, %v565_v2  ;;  %v298_v63 = vadd.f32 %v297_v54, %v296_v47 }
 0x37e   :  { %v325_v57 = vadd.f32 %v324_v52, %v323_v51 }
 0x37f   :  { %v304_v58 = vrot.slane %v303_v55, 1  ;;  %v316_v59 = vsel %vm57_vm0, %v314_v56, 0.0 }
 0x380   :  { %v326_v60 = vrot.slane %v325_v57, 2  ;;  %v317_v61 = vrot.slane %v316_v59, 4 }
 0x381   :  { %v332_v62 = vpop.permute.xlu1 %331  ;;  %v305_v0 = vadd.f32 %v304_v58, %v303_v55 }
 0x382   :  { %v327_v1 = vadd.f32 %v326_v60, %v325_v57  ;;  %v318_v4 = vadd.f32 %v317_v61, %v316_v59  ;;  %v338_v5 = vmul.f32 %v332_v62, %v565_v2 }
 0x383   :  { %v361_v6 = vsel %vm356_vm3, %v305_v0, %v298_v63 }
 0x384   :  { %v319_v7 = vrot.slane %v318_v4, 2  ;;  %v340_v8 = vsel %vm57_vm0, %v338_v5, 0.0  ;;  %362 = vrot.lane.b32.xlu1 %v361_v6, %s530_s2  ;;  %v328_v11 = vrot.slane %v327_v1, 1 }
 0x385   :  { %v341_v9 = vrot.slane %v340_v8, 4  ;;  %v336_v10 = vpop.permute.xlu1 %335 }
 0x386   :  { %v320_v12 = vadd.f32 %v319_v7, %v318_v4  ;;  %v339_v13 = vmul.f32 %v336_v10, %v573_v3  ;;  %v329_v20 = vadd.f32 %v328_v11, %v327_v1 }
 0x387   :  { %v342_v14 = vadd.f32 %v341_v9, %v340_v8 }
 0x388   :  { %v321_v15 = vrot.slane %v320_v12, 1  ;;  %v347_v16 = vsel %vm57_vm0, %v339_v13, 0.0 }
 0x389   :  { %v343_v17 = vrot.slane %v342_v14, 2  ;;  %v348_v18 = vrot.slane %v347_v16, 4 }
 0x38a   :  { %v322_v19 = vadd.f32 %v321_v15, %v320_v12  ;;  %v259_v31 = vpop.permute.xlu1 %258 }
 0x38b   :  { %v344_v21 = vadd.f32 %v343_v17, %v342_v14  ;;  %v349_v22 = vadd.f32 %v348_v18, %v347_v16  ;;  %v266_v34 = vmul.f32 %v259_v31, %v565_v2 }
 0x38c   :  { %v367_v23 = vsel %vm356_vm3, %v329_v20, %v322_v19 }
 0x38d   :  { %v350_v24 = vrot.slane %v349_v22, 2  ;;  %368 = vrot.lane.b32.xlu0 %v367_v23, %s531_s3  ;;  %v345_v25 = vrot.slane %v344_v21, 1  ;;  %v268_v36 = vsel %vm57_vm0, %v266_v34, 0.0 }
 0x38e   :  { %v264_v32 = vpop.permute.xlu1 %263  ;;  %v269_v38 = vrot.slane %v268_v36, 4 }
 0x38f   :  { %v351_v26 = vadd.f32 %v350_v24, %v349_v22  ;;  %v346_v28 = vadd.f32 %v345_v25, %v344_v21  ;;  %v267_v33 = vmul.f32 %v264_v32, %v573_v3 }
 0x390   :  { %v270_v40 = vadd.f32 %v269_v38, %v268_v36 }
 0x391   :  { %v352_v27 = vrot.slane %v351_v26, 1  ;;  %v275_v35 = vsel %vm57_vm0, %v267_v33, 0.0 }
 0x392   :  { %v276_v37 = vrot.slane %v275_v35, 4  ;;  %v271_v42 = vrot.slane %v270_v40, 2 }
 0x393   :  { %v353_v29 = vadd.f32 %v352_v27, %v351_v26 }
 0x394   :  { %v277_v39 = vadd.f32 %v276_v37, %v275_v35  ;;  %v272_v44 = vadd.f32 %v271_v42, %v270_v40 }
 0x395   :  { %v373_v30 = vsel %vm356_vm3, %v353_v29, %v346_v28 }
 0x396   :  { %374 = vrot.lane.b32.xlu1 %v373_v30, %s532_s29  ;;  %v278_v41 = vrot.slane %v277_v39, 2  ;;  %v273_v46 = vrot.slane %v272_v44, 1 }
 0x398   :  { %v279_v43 = vadd.f32 %v278_v41, %v277_v39  ;;  %v274_v48 = vadd.f32 %v273_v46, %v272_v44 }
 0x39a   :  { %v280_v45 = vrot.slane %v279_v43, 1 }
 0x39c   :  { %v281_v47 = vadd.f32 %v280_v45, %v279_v43 }
 0x39e   :  { %v357_v2 = vsel %vm356_vm3, %v281_v47, %v274_v48 }
 0x3f6   :  { %v363_v49 = vpop.permute.xlu1 %362 }
 0x3f7   :  { %v377_v50 = vsel %vm57_vm0, %v357_v2, %v363_v49 }
 0x3ff   :  { %v369_v3 = vpop.permute.xlu0 %368 }
 0x400   :  { %v379_v51 = vsel %vm378_vm4, %v377_v50, %v369_v3 }
 0x408   :  { %v375_v52 = vpop.permute.xlu1 %374 }
 0x409   :  { %v381_v53 = vsel %vm380_vm5, %v379_v51, %v375_v52 }
 0x40a   :  { %382 = vst [vmem:[#allocation7] sm:$0x3] %v381_v53 }
 0x40b   :  { %507 = shalt.err (!%p504_p0)
}
 0x40c   :  { %392 = dma.vmem_to_hbm [thread:$0]  %s390_s5, 32, %s615_s4, [#allocation4]  }
 0x40d   :  { %520 = dma.done.wait [#allocation4], 32  }
 0x40e   :  { %521 = vsyncadd [#allocation4], 4294967264 }
 0x40f   :  { %396 = vsyncpa [#allocation3], 1 }
 0x410   :  { %397 = vsyncpa [#allocation6], 1 }
 0x411   :  { %398 = vsyncpa [#allocation4], 1 }

</bundles_post_ra>
